<compile_context>
chip_gen: v5e
topology: v5e:2x2
jax: 0.10.0
libtpu: 0.0.40
codegen_flags: <defaults>
</compile_context>

<pallas_src>
import math

import jax
import jax.numpy as jnp
from jax import lax
from jax.experimental import pallas as pl
from jax.experimental.pallas import tpu as pltpu


def _round_up(x, m):
    return (x + m - 1) // m * m


def _causal_conv_gemm_kernel(x_ref, w_ref, b_ref, o_ref):
    # x_ref : (1, K, tM)       im2col columns, lane-dense
    # w_ref : (out_ch, K)      flattened conv weights
    # b_ref : (out_ch, 1)      bias (broadcast over lanes)
    # o_ref : (1, out_ch, tM)  lane-dense output tile
    acc = jnp.dot(w_ref[...], x_ref[0], preferred_element_type=jnp.float32)
    o_ref[0] = (acc + b_ref[...]).astype(o_ref.dtype)


def causal_conv(x, weight, bias, kernel_size, stride, *, m_tile=512):
    """x: (B, C, F, T) NCHW; weight: (out_ch, in_ch, kh, kw); bias: (out_ch,)."""
    kh, kw = kernel_size
    sf, st = stride
    # TODO(synk): time stride > 1 not implemented (CausalConv in CRN uses stride (., 1))
    assert st == 1, "time stride must be 1"

    B, C, F, T = x.shape
    out_ch = weight.shape[0]
    pad_f = kh // 2
    f_out = (F + 2 * pad_f - kh) // sf + 1
    K = kh * kw * C
    M = f_out * T

    # ---- plain-JAX prologue: causal pad + im2col (layout plumbing only) ----
    # F padded symmetrically, T padded on the LEFT only (causal).
    x_p = jnp.pad(x, ((0, 0), (0, 0), (pad_f, pad_f), (kw - 1, 0)))
    # One (C, f_out, T) slab per tap (ki, kj); the frequency stride is applied
    # here, so the kernel needs no strided / unaligned slicing at all.
    slabs = [x_p[:, :, ki:ki + sf * f_out:sf, kj:kj + T]
             for ki in range(kh) for kj in range(kw)]
    cols = jnp.stack(slabs, axis=1).reshape(B, K, M)     # k=(ki,kj,c), m=(f,t)
    # TODO(synk): for large-C layers (C >= 128) the kh*kw x im2col inflation is
    # not worth the HBM traffic; a per-tap in-kernel accumulation path should
    # be used there instead.

    # Lane-dense M tiling: tile is a multiple of 128 lanes, capped at m_tile.
    tM = min(m_tile, _round_up(M, 128))
    M_pad = _round_up(M, tM)
    if M_pad != M:
        cols = jnp.pad(cols, ((0, 0), (0, 0), (0, M_pad - M)))

    # Weight flattened to one 2-D tile (matching k = (ki, kj, c) order); bias
    # as (out_ch, 1) so it broadcasts over lanes inside the kernel.
    w2 = jnp.transpose(weight, (0, 2, 3, 1)).reshape(out_ch, K)
    b2 = bias.reshape(out_ch, 1)
    # TODO(synk): on v6e/v7x cast cols/w2 to bf16 (keep f32 accumulation) when
    # the model tolerates it; kept f32 here so the 1e-4 self-test passes.

    itemsize = jnp.dtype(x.dtype).itemsize
    cost = pl.CostEstimate(
        flops=2 * B * out_ch * K * M_pad,
        transcendentals=0,
        bytes_accessed=int((B * K * M_pad + out_ch * K + out_ch
                            + B * out_ch * M_pad) * itemsize),
    )

    out = pl.pallas_call(
        _causal_conv_gemm_kernel,
        out_shape=jax.ShapeDtypeStruct((B, out_ch, M_pad), x.dtype),
        grid=(B, M_pad // tM),
        in_specs=[
            pl.BlockSpec((1, K, tM), lambda b, m: (b, 0, m)),
            pl.BlockSpec((out_ch, K), lambda b, m: (0, 0)),
            pl.BlockSpec((out_ch, 1), lambda b, m: (0, 0)),
        ],
        out_specs=pl.BlockSpec((1, out_ch, tM), lambda b, m: (b, 0, m)),
        compiler_params=pltpu.CompilerParams(
            dimension_semantics=("parallel", "parallel")),
        cost_estimate=cost,
    )(cols, w2, b2)

    # Epilogue: drop M padding, un-flatten (f_out, T).  Already NCHW.
    return out[:, :, :M].reshape(B, out_ch, f_out, T)


def causal_conv_reference(x, weight, bias, kernel_size, stride):
    """Pure-JAX reference mirroring the PyTorch forward exactly."""
    kh, kw = kernel_size
    T = x.shape[-1]
    y = lax.conv_general_dilated(
        x, weight, window_strides=stride,
        padding=[(kh // 2, kh // 2), (kw - 1, kw - 1)],
        dimension_numbers=("NCHW", "OIHW", "NCHW"))
    y = y + bias.reshape(1, -1, 1, 1)
    return y[..., :T]


if __name__ == "__main__":
    # small shapes consistent with the module: B, C(in_ch), F(freq), T(time)
    B, in_ch, F, T = 2, 4, 16, 16
    out_ch = 8
    kernel_size = (3, 2)
    stride = (2, 1)

    key = jax.random.PRNGKey(0)
    kx, kw_, kb = jax.random.split(key, 3)
    fan_in = in_ch * kernel_size[0] * kernel_size[1]
    x = jax.random.normal(kx, (B, in_ch, F, T), dtype=jnp.float32)
    weight = jax.random.normal(
        kw_, (out_ch, in_ch, kernel_size[0], kernel_size[1]),
        dtype=jnp.float32) * (1.0 / math.sqrt(fan_in))
    bias = jax.random.uniform(
        kb, (out_ch,), dtype=jnp.float32,
        minval=-1.0 / math.sqrt(fan_in), maxval=1.0 / math.sqrt(fan_in))

    out = causal_conv(x, weight, bias, kernel_size, stride)
    out = jax.block_until_ready(out)

    ref = causal_conv_reference(x, weight, bias, kernel_size, stride)
    assert out.shape == ref.shape, (out.shape, ref.shape)
    assert jnp.allclose(out, ref, atol=1e-4, rtol=1e-4), \
        float(jnp.max(jnp.abs(out - ref)))
    print("KERNEL_OK")
</pallas_src>

<mosaic_0001>
module attributes {stable_mosaic.version = 11 : i64} {
  func.func @_causal_conv_gemm_kernel(%arg0: i32, %arg1: i32, %arg2: memref<1x24x128xf32, #tpu.memory_space<vmem>>, %arg3: memref<8x24xf32, #tpu.memory_space<vmem>>, %arg4: memref<8x1xf32, #tpu.memory_space<vmem>>, %arg5: memref<1x8x128xf32, #tpu.memory_space<vmem>>) attributes {dimension_semantics = [#tpu.dimension_semantics<parallel>, #tpu.dimension_semantics<parallel>], iteration_bounds = array<i64: 2, 1>, scalar_prefetch = 0 : i64, scratch_operands = 0 : i64, tpu.core_type = #tpu.core_type<tc>, window_params = [{transform_indices = @transform_0, window_bounds = array<i64: 1, 24, 128>}, {pipeline_mode = #tpu.pipeline_mode<synchronous>, transform_indices = @transform_1, window_bounds = array<i64: 8, 24>}, {pipeline_mode = #tpu.pipeline_mode<synchronous>, transform_indices = @transform_2, window_bounds = array<i64: 8, 1>}, {transform_indices = @transform_3, window_bounds = array<i64: 1, 8, 128>}]} {
    %c0 = arith.constant 0 : index
    %c0_0 = arith.constant 0 : index
    %0 = vector.load %arg3[%c0, %c0_0] : memref<8x24xf32, #tpu.memory_space<vmem>>, vector<8x24xf32>
    %c0_1 = arith.constant 0 : index
    %c0_2 = arith.constant 0 : index
    %c0_3 = arith.constant 0 : index
    %1 = vector.load %arg2[%c0_1, %c0_2, %c0_3] : memref<1x24x128xf32, #tpu.memory_space<vmem>>, vector<1x24x128xf32>
    %2 = vector.shape_cast %1 : vector<1x24x128xf32> to vector<24x128xf32>
    %cst = arith.constant dense<0.000000e+00> : vector<8x128xf32>
    %3 = tpu.matmul %0, %2, %cst {dimension_numbers = #tpu.dot_dimension_numbers<[1], [0], [0], [1], [0, 0, 1, 1], [], []>} : vector<8x24xf32>, vector<24x128xf32>, vector<8x128xf32> -> vector<8x128xf32>
    %c0_4 = arith.constant 0 : index
    %c0_5 = arith.constant 0 : index
    %4 = vector.load %arg4[%c0_4, %c0_5] : memref<8x1xf32, #tpu.memory_space<vmem>>, vector<8x1xf32>
    %5 = vector.broadcast %4 : vector<8x1xf32> to vector<8x128xf32>
    %6 = arith.addf %3, %5 : vector<8x128xf32>
    %c0_6 = arith.constant 0 : index
    %c0_7 = arith.constant 0 : index
    %c0_8 = arith.constant 0 : index
    %7 = vector.load %arg5[%c0_6, %c0_7, %c0_8] : memref<1x8x128xf32, #tpu.memory_space<vmem>>, vector<1x8x128xf32>
    %8 = vector.shape_cast %7 : vector<1x8x128xf32> to vector<8x128xf32>
    %9 = vector.shape_cast %6 : vector<8x128xf32> to vector<1x8x128xf32>
    tpu.vector_store %arg5[%c0_6, %c0_7, %c0_8], %9 {strides = array<i32>} : memref<1x8x128xf32, #tpu.memory_space<vmem>>, vector<1x8x128xf32>,
    return
  }
  func.func @transform_0(%arg0: i32, %arg1: i32) -> (i32, i32, i32) {
    %c0_i32 = arith.constant 0 : i32
    %c0_i32_0 = arith.constant 0 : i32
    return %arg0, %c0_i32, %arg1 : i32, i32, i32
  }
  func.func @transform_1(%arg0: i32, %arg1: i32) -> (i32, i32) {
    %c0_i32 = arith.constant 0 : i32
    %c0_i32_0 = arith.constant 0 : i32
    %c0_i32_1 = arith.constant 0 : i32
    return %c0_i32, %c0_i32_0 : i32, i32
  }
  func.func @transform_2(%arg0: i32, %arg1: i32) -> (i32, i32) {
    %c0_i32 = arith.constant 0 : i32
    %c0_i32_0 = arith.constant 0 : i32
    %c0_i32_1 = arith.constant 0 : i32
    return %c0_i32, %c0_i32_0 : i32, i32
  }
  func.func @transform_3(%arg0: i32, %arg1: i32) -> (i32, i32, i32) {
    %c0_i32 = arith.constant 0 : i32
    %c0_i32_0 = arith.constant 0 : i32
    return %arg0, %c0_i32, %arg1 : i32, i32, i32
  }
}

</mosaic_0001>

<bundles_post_ra>
// kernel: tpu_custom_call.1
= control target key start
LH: loop header
LB: loop body
LE: loop exit
PB: predicated region body
PF: predicated region fallthrough
CT: control target
= control target key end

     0   :  { %8 = vsyncpa [#allocation3], 0  ;;  %s686_s0 = inlined_call_operand.hbm [shape: f32[2,24,128], index: 0, kind: input, shape index: {}]   ;;  %s687_s1 = inlined_call_operand.vmem [shape: f32[8,24], index: 1, kind: input, shape index: {}]   ;;  %s688_s2 = inlined_call_operand.vmem [shape: f32[8,1], index: 2, kind: input, shape index: {}]   ;;  %s689_s3 = inlined_call_operand.hbm [shape: f32[2,8,128], index: 3, kind: output, shape index: {}]  }
   0x1   :  { %10 = vsyncpa [#allocation3 + $0x1], 0 }
   0x2   :  { %11 = vsyncpa [#allocation4], 0 }
   0x3   :  { %13 = vsyncpa [#allocation4 + $0x1], 0  ;;  %s559_s12 = smov 0   ;;  %s561_s13 = smov 0  }
   0x4   :  { %s563_s14 = smov 0   ;;  %s565_s15 = smov 0  }
   0x5   :  { %s567_s16 = smov 0   ;;  %s569_s17 = smov 0  }
   0x6 LB: > { %s341_s18 = sadd.s32 4294967295, %s534_s17   ;;  %s342_s19 = sadd.s32 4294967294, %s534_s17   ;;  %s534_s17 = sphi %s569_s17, %s19_s17   ;;  %s530_s16 = sphi %s567_s16, %s698_s16   ;;  %s526_s15 = sphi %s565_s15, %s697_s15   ;;  %s522_s14 = sphi %s563_s14, %s696_s14   ;;  %s518_s13 = sphi %s561_s13, %s695_s13   ;;  %s514_s12 = sphi %s559_s12, %s694_s12  }
   0x7   : > { %s31_s20 = sadd.s32 1, %s530_s16  ;;  %s40_s21 = sadd.s32 1, %s522_s14 }
   0x8   : > { %p33_p0 = scmp.ge.s32.totalorder %s31_s20, 2  ;;  %p47_p1 = scmp.ne.s32.totalorder %s522_s14, %s518_s13 }
   0x9   : > { %p48_p2 = scmp.eq.s32.totalorder %s534_s17, 0  ;;  %p53_p3 = scmp.ne.s32.totalorder %s518_s13, %s514_s12 }
   0xa   : > { %s700_s20 = smov (%p33_p0, %s31_s20), 0  ;;  %p54_p5 = scmp.eq.s32.totalorder %s341_s18, 0 }
   0xb   : > { %p600_p4 = por %p48_p2, %p47_p1  ;;  %s35_s23 = ssub.s32 %s530_s16, %s700_s20 }
   0xc   : > { %p121_p6 = scmp.eq.s32.totalorder %s341_s18, 1  ;;  %p38_p7 = scmp.eq.s32.totalorder %s35_s23, 0 }
   0xd   : > { %p606_p8 = por %p54_p5, %p53_p3  ;;  %p127_p10 = scmp.eq.s32.totalorder %s342_s19, 1 }
   0xe   : > { %p610_p9 = por %p121_p6, %p47_p1  ;;  %p344_p12 = scmp.ge.s32.totalorder %s534_s17, 2 }
   0xf   : > { %s615_s26 = scalar_select %p38_p7, %s522_s14, %s40_s21  }
  0x10   : > { %p617_p11 = por %p127_p10, %p53_p3  ;;  %p368_p13 = scmp.lt.s32.totalorder %s534_s17, 2 }
  0x11   : > { %s153_s28 = sand.u32 1, %s522_s14   ;;  %s354_s30 = smul.u32 24, %s530_s16 }
  0x12   : > { %s353_s29 = smul.u32 24, %s153_s28  ;;  %p361_p0 = pnand %p368_p13, %p600_p4 }
  0x13   : > { %s163_s6 = scalar_lea.hbm %s686_s0, %s354_s30  ;;  %p346_p1 = scmp.ge.s32.totalorder %s534_s17, 1 }
  0x14   : > { %s157_s7 = scalar_lea.vmem [#allocation2], %s353_s29  ;;  %s164_s9 = sshll.u32 %s163_s6, 4  ;;  %s165_s9 = int_to_ptr.hbm [resolvable:$true] %s164_s9 }
  0x15   : > { %s166_s8 = sshll.u32 %s157_s7, 4  ;;  %s154_s10 = scalar_lea.sflag [#allocation3], %s153_s28  ;;  %s167_s8 = int_to_ptr.vmem [resolvable:$true] %s166_s8 }
  0x16   : > { %s536_s11 = smov 128   ;;  %s537_s18 = smov 8  }
  0x17   : > { %363 = dma.hbm_to_vmem [thread:$0]  (!%p361_p0), %s165_s9, 384, %s167_s8, %s154_s10, %s536_s11, %s536_s11, %s537_s18  }
  0x18   : > { %p174_p2 = scmp.lt.s32.totalorder %s534_s17, 3 }
  0x1a   : > { %p175_p3 = pnand %p346_p1, %p174_p2 }
  0x1b   : > { %s633_s19 = sand.u32 (!%p175_p3), 1, %s518_s13  }
  0x1c   : > { %178 = sbr.rel (%p175_p3) target bundleno = 171 (0xab), region = 32  ;;  %s181_s22 = scalar_lea.sflag (!%p175_p3), [#allocation3], %s633_s19 }
  0x1d   : > { %s355_s21 = smul.u32 (!%p175_p3), 24, %s633_s19 }
  0x1f   : > { %s184_s23 = scalar_lea.vmem (!%p175_p3), [#allocation2], %s355_s21 }
  0x21   : > { %505 = dma.done.wait (%p606_p8), %s181_s22, 384  }
  0x22   : > { %507 = vsyncadd (%p606_p8), %s181_s22, 4294966912  ;;  %v538_v0 = vmov 0   ;;  %v211_v1 = vld [vmem:[%s184_s23 + $0x10] sm:$0xff]  ;;  %v210_v2 = vld [vmem:[%s184_s23 + $0x8] sm:$0xff]  ;;  %vm218_vm0 = vcmask 195584   ;;  %s347_s24 = sshll.u32 %s633_s19, 3 }
  0x23   : > { %421 = vset.pattern.permute.xlu0 %v538_v0  ;;  %235 = vmatpush.msra.mxu0 %v211_v1  ;;  %v212_v3 = vld [vmem:[%s688_s2] sm:$0xff]  ;;  %s350_s5 = sshll.u32 %s526_s15, 3  ;;  %s207_s9 = scalar_lea.vmem [#allocation5], %s347_s24 }
  0x24   : > { %v209_v4 = vld [vmem:[%s184_s23] sm:$0xff]  ;;  %215 = vperm.xlu0 %421, %v212_v3   ;;  %s255_s8 = scalar_lea.hbm %s689_s3, %s350_s5  ;;  %s257_s10 = sshll.u32 %s207_s9, 4  ;;  %s258_s10 = int_to_ptr.vmem [resolvable:$true] %s257_s10 }
  0x25   : > { %236 = vmatpush.msra.mxu0 %v210_v2  ;;  %v208_v5 = vld [vmem:[%s687_s1] sm:$0xff]  ;;  %s259_s11 = sshll.u32 %s255_s8, 4  ;;  %s244_s18 = scalar_lea.sflag [#allocation4], %s633_s19  ;;  %s260_s11 = int_to_ptr.hbm [resolvable:$true] %s259_s11 }
  0x26   : > { %s466_s21 = sshra.s32 %s260_s11, 4  ;;  %s472_s28 = scalar_lea.hbm %s689_s3, 16  ;;  %s467_s21 = int_to_ptr.hbm [resolvable:$true] %s466_s21 }
  0x27   : > { %237 = vmatpush.msra.mxu0 %v209_v4  ;;  %s468_s22 = scalar_lea.hbm %s467_s21, 8  ;;  %p473_p7 = scmp.lt.s32.totalorder %s467_s21, %s689_s3 }
  0x28   : > { %348 = vmatmul.msk.f32.vlgmr.msra.gmra.mxu0 %vm218_vm0, %v208_v5  ;;  %p469_p4 = scmp.ne.s32.totalorder %s467_s21, %s468_s22  ;;  %p474_p8 = scmp.lt.s32.totalorder %s472_s28, %s468_s22 }
  0x2a   : > { %p470_p5 = pnand %p469_p4, %p610_p9  ;;  %p475_p10 = por %p474_p8, %p473_p7 }
  0x2c   : > { %p471_p6 = pneg %p470_p5 }
  0x2e   : > { %p476_p13 = pnand %p475_p10, %p471_p6 }
  0x96   : > { %v216_v6 = vpop.permute.xlu0 %215 }
  0xa5   : > { %v239_v7 = vpop.f32.mrf.mxu0 }
  0xa6   : > { %v240_v8 = vadd.f32 %v239_v7, %v216_v6 }
  0xa8   : > { %242 = vst [vmem:[%s207_s9] sm:$0xff] %v240_v8 }
  0xa9   : > { %479 = shalt.err (!%p476_p13)
}
  0xaa   : > { %358 = dma.vmem_to_hbm [thread:$0]  (%p610_p9), %s258_s10, 128, %s260_s11, %s244_s18  }
  0xab PF: > { %s271_s19 = sand.u32 1, %s514_s12   ;;  %p365_p0 = pnand %p344_p12, %p617_p11 }
  0xac   : > { %s272_s4 = scalar_lea.sflag [#allocation4], %s271_s19 }
  0xad   : > { %p366_p1 = pneg %p365_p0 }
  0xaf   : > { %509 = dma.done.wait (%p366_p1), %s272_s4, 128  }
  0xb0   : > { %511 = vsyncadd (%p366_p1), %s272_s4, 4294967168  ;;  %s19_s17 = sadd.s32 1, %s534_s17   ;;  %s694_s12 = smov %s518_s13 }
  0xb1   : > { %p16_p2 = scmp.ge.s32.totalorder %s19_s17, 4   ;;  %s695_s13 = smov %s522_s14 }
  0xb2   : > { %s696_s14 = smov %s615_s26  ;;  %s697_s15 = smov %s530_s16 }
  0xb3   : > { %s698_s16 = smov %s700_s20  ;;  %18 = sbr.rel (!%p16_p2) target bundleno = 6 (0x6), region = 77 }
  0xb8   :  { %278 = vsyncpa [#allocation3], 1 }
  0xb9   :  { %280 = vsyncpa [#allocation3 + $0x1], 1 }
  0xba   :  { %281 = vsyncpa [#allocation4], 1 }
  0xbb   :  { %283 = vsyncpa [#allocation4 + $0x1], 1 }

</bundles_post_ra>
